<compile_context>
chip_gen: v7x
topology: tpu7x:2x2x1
jax: 0.10.0
libtpu: 0.0.40
codegen_flags: <defaults>
</compile_context>

<pallas_src>
import math

import jax
import jax.numpy as jnp
from jax import lax
from jax.experimental import pallas as pl
from jax.experimental.pallas import tpu as pltpu

_INV_SQRT2 = 0.7071067811865476


def _round_up(x, m):
    return ((x + m - 1) // m) * m


def _cdiv(a, b):
    return (a + b - 1) // b


def _vmem_capacity_bytes():
    try:
        info = pltpu.get_tpu_info()
        return int(getattr(info, "vmem_capacity_bytes", 64 << 20))
    except Exception:
        return 64 << 20  # conservative (v7x-sized) fallback


def _make_kernel(compute_dtype, epilogue_dtype):
    def kernel(x_ref, w_ref, b_ref, o_ref):
        # x_ref: (tm, H) activation tile, w_ref: (H, tn) weight tile (VMEM-resident
        # when I is untiled), b_ref: (1, tn) f32 bias, o_ref: (tm, tn).
        # Cast activations to the MXU operand dtype in-VMEM (no-op if already there).
        x = x_ref[...].astype(compute_dtype)
        y = jnp.dot(x, w_ref[...], preferred_element_type=jnp.float32)  # f32 acc
        y = y + b_ref[...]                                              # bias in f32
        y = y.astype(epilogue_dtype)
        half = jnp.asarray(0.5, epilogue_dtype)
        one = jnp.asarray(1.0, epilogue_dtype)
        inv_sqrt2 = jnp.asarray(_INV_SQRT2, epilogue_dtype)
        # Exact erf-based GELU (matches PyTorch); multiply by 1/sqrt(2), no divide.
        y = half * y * (one + lax.erf(y * inv_sqrt2))
        o_ref[...] = y.astype(o_ref.dtype)
    return kernel


def bert_intermediate(hidden_states, w_hi, bias, *, tm=None, out_dtype=None,
                      epilogue_dtype=jnp.float32):
    """Fused gelu(x @ W + b) (BertIntermediate forward).

    hidden_states: (B, S, H) activations.
    w_hi:          (H, I) weight, already transposed from PyTorch's (I, H) and cast
                   (e.g. to bf16) ONCE at model-load time. Its dtype is the MXU
                   operand dtype.
    bias:          (I,) bias.
    tm:            target rows per M tile (default generation-aware: 1024 on
                   128 MiB-VMEM parts, 512 on 64 MiB parts).
    out_dtype:     output dtype (default hidden_states.dtype). bf16 halves Y
                   writeback bytes and output-tile VMEM.
    epilogue_dtype: dtype for the bias+GELU epilogue. f32 (default) = exact
                   PyTorch parity. jnp.bfloat16 moves the erf polynomial onto
                   bf16 VPU/EUP lanes on v6e/v7x (the binding slot there).
    """
    B, S, H = hidden_states.shape
    Hw, I = w_hi.shape
    assert Hw == H and bias.shape == (I,)
    if out_dtype is None:
        out_dtype = hidden_states.dtype
    compute_dtype = w_hi.dtype  # weight cast happens at load time, never per call

    M = B * S
    x2d = hidden_states.reshape(M, H)
    b2d = bias.reshape(1, I).astype(jnp.float32)

    xb = jnp.dtype(x2d.dtype).itemsize
    wb = jnp.dtype(w_hi.dtype).itemsize
    ob = jnp.dtype(out_dtype).itemsize

    # Generation-aware VMEM budget and default M tile.
    cap = _vmem_capacity_bytes()
    small_vmem = cap <= (64 << 20)                 # v7x-class (64 MiB / TC) parts
    if small_vmem:
        budget = cap - (8 << 20)                   # leave compiler-scratch headroom
    else:
        budget = min(cap - (16 << 20), 100 << 20)  # 128 MiB v5e / v6e parts
    if tm is None:
        tm = 512 if small_vmem else 1024

    single_buf = hasattr(pl, "Buffered")           # single-buffer constant-index W/b

    def balance(tm_target):
        # Balanced M tiling: minimizes padding instead of padding up to tm-1 rows.
        nt = max(1, _cdiv(M, tm_target))
        return min(_round_up(_cdiv(M, nt), 8), _round_up(M, 8))

    def footprint(tm_e, tn_e):
        ni_e = _cdiv(I, tn_e)
        const_bufs = 1 if (single_buf and ni_e == 1) else 2
        return (2 * tm_e * H * xb                 # x tiles (double-buffered)
                + const_bufs * H * tn_e * wb      # weight
                + const_bufs * tn_e * 4           # bias (f32)
                + 2 * tm_e * tn_e * ob)           # output tiles

    tm_eff = balance(tm)
    tn_eff = I
    # Shrink the M tile first; then (fallback) tile I so big intermediate sizes
    # still fit 64 MiB parts, at the cost of extra weight HBM reads per M tile.
    while footprint(tm_eff, tn_eff) > budget and tm_eff > 256:
        tm_eff = balance(max(256, tm_eff // 2))
    while (footprint(tm_eff, tn_eff) > budget
           and tn_eff % 256 == 0 and tn_eff >= 512):
        tn_eff //= 2

    # 64 MiB parts (2 TCs): keep the parallel M-tile count even so no TC idles.
    if small_vmem:
        nm_try = _cdiv(M, tm_eff)
        if nm_try > 1 and nm_try % 2 == 1:
            tm_eff = min(_round_up(_cdiv(M, nm_try + 1), 8), tm_eff)

    nm = _cdiv(M, tm_eff)
    ni = _cdiv(I, tn_eff)
    M_pad = nm * tm_eff
    if M_pad != M:
        # Balanced tiling keeps this to at most a few sublanes of padding.
        x2d = jnp.pad(x2d, ((0, M_pad - M), (0, 0)))

    fp = footprint(tm_eff, tn_eff)
    assert fp <= budget, (
        f"VMEM footprint {fp / 2**20:.1f} MiB exceeds budget "
        f"{budget / 2**20:.1f} MiB; cast the weight to bf16 or lower tm")
    vmem_limit = int(min(max(fp + (16 << 20), 32 << 20), budget))

    # Constant-block-index weight/bias: a second pipeline buffer is pure waste.
    const_kwargs = {}
    if single_buf and ni == 1:
        const_kwargs["pipeline_mode"] = pl.Buffered(1)
    w_spec = pl.BlockSpec((H, tn_eff), lambda i, j: (0, j), **const_kwargs)
    b_spec = pl.BlockSpec((1, tn_eff), lambda i, j: (0, j), **const_kwargs)

    kernel = _make_kernel(compute_dtype, epilogue_dtype)

    out = pl.pallas_call(
        kernel,
        out_shape=jax.ShapeDtypeStruct((M_pad, I), out_dtype),
        grid_spec=pltpu.PrefetchScalarGridSpec(
            num_scalar_prefetch=0,
            grid=(nm, ni),
            in_specs=[
                # x tile: block index constant along the inner I axis -> fetched
                # once per M tile even when I is tiled.
                pl.BlockSpec((tm_eff, H), lambda i, j: (i, 0)),
                w_spec,
                b_spec,
            ],
            out_specs=pl.BlockSpec((tm_eff, tn_eff), lambda i, j: (i, j)),
        ),
        compiler_params=pltpu.CompilerParams(
            dimension_semantics=("parallel", "arbitrary"),  # M sharded across TCs
            vmem_limit_bytes=vmem_limit,
        ),
    )(x2d, w_hi, b2d)

    if M_pad != M:
        out = out[:M]
    return out.reshape(B, S, I)


if __name__ == "__main__":
    # Small config: hidden_size=32, intermediate_size=128, batch=2, seq=8.
    B, S, H, I = 2, 8, 32, 128

    key = jax.random.PRNGKey(0)
    kx, kw, kb = jax.random.split(key, 3)
    x = jax.random.normal(kx, (B, S, H), dtype=jnp.float32)
    # Synthetic checkpoint in PyTorch nn.Linear layout: weight (out, in) = (I, H).
    weight = jax.random.normal(kw, (I, H), dtype=jnp.float32) * 0.02
    bias = jax.random.normal(kb, (I,), dtype=jnp.float32) * 0.02

    # "Model load" time: transpose once; production additionally casts to bf16 once
    # (never per call).
    w_f32 = jnp.asarray(weight.T)            # (H, I), f32
    w_bf16 = w_f32.astype(jnp.bfloat16)      # cast once at load -> bf16 MXU operands

    # Pure-JAX reference (exact erf GELU, f32).
    ref = x.reshape(-1, H) @ weight.T + bias
    ref = ref * 0.5 * (1.0 + lax.erf(ref / math.sqrt(2.0)))
    ref = ref.reshape(B, S, I)

    # f32 MXU path: exact PyTorch parity.
    out_f32 = jax.block_until_ready(bert_intermediate(x, w_f32, bias))
    assert jnp.allclose(out_f32, ref, atol=1e-5, rtol=1e-5), "f32 mismatch vs reference"

    # Production path: bf16 MXU operands (weight cast at load), f32 accumulation,
    # f32 exact-erf epilogue.
    out_bf16 = jax.block_until_ready(bert_intermediate(x, w_bf16, bias))
    assert jnp.allclose(out_bf16, ref, atol=3e-2, rtol=3e-2), "bf16-MXU mismatch vs reference"

    # bf16 output: halves Y writeback bytes and output-tile VMEM.
    out_bf16_o = jax.block_until_ready(
        bert_intermediate(x, w_bf16, bias, out_dtype=jnp.bfloat16))
    assert jnp.allclose(out_bf16_o.astype(jnp.float32), ref, atol=5e-2, rtol=5e-2), \
        "bf16-output mismatch vs reference"

    print("KERNEL_OK")
</pallas_src>

<mosaic_0001>
module attributes {stable_mosaic.version = 11 : i64} {
  func.func @kernel(%arg0: i32, %arg1: i32, %arg2: memref<16x32xf32, #tpu.memory_space<vmem>>, %arg3: memref<32x128xf32, #tpu.memory_space<vmem>>, %arg4: memref<1x128xf32, #tpu.memory_space<vmem>>, %arg5: memref<16x128xf32, #tpu.memory_space<vmem>>) attributes {dimension_semantics = [#tpu.dimension_semantics<parallel>, #tpu.dimension_semantics<arbitrary>], iteration_bounds = array<i64: 1, 1>, scalar_prefetch = 0 : i64, scratch_operands = 0 : i64, tpu.core_type = #tpu.core_type<tc>, window_params = [{transform_indices = @transform_0, window_bounds = array<i64: 16, 32>}, {pipeline_mode = #tpu.pipeline_mode<synchronous>, transform_indices = @transform_1, window_bounds = array<i64: 32, 128>}, {pipeline_mode = #tpu.pipeline_mode<synchronous>, transform_indices = @transform_2, window_bounds = array<i64: 1, 128>}, {transform_indices = @transform_3, window_bounds = array<i64: 16, 128>}]} {
    %c0 = arith.constant 0 : index
    %c0_0 = arith.constant 0 : index
    %0 = vector.load %arg2[%c0, %c0_0] : memref<16x32xf32, #tpu.memory_space<vmem>>, vector<16x32xf32>
    %c0_1 = arith.constant 0 : index
    %c0_2 = arith.constant 0 : index
    %1 = vector.load %arg3[%c0_1, %c0_2] : memref<32x128xf32, #tpu.memory_space<vmem>>, vector<32x128xf32>
    %cst = arith.constant dense<0.000000e+00> : vector<16x128xf32>
    %2 = tpu.matmul %0, %1, %cst {dimension_numbers = #tpu.dot_dimension_numbers<[1], [0], [0], [1], [0, 0, 1, 1], [], []>} : vector<16x32xf32>, vector<32x128xf32>, vector<16x128xf32> -> vector<16x128xf32>
    %c0_3 = arith.constant 0 : index
    %c0_4 = arith.constant 0 : index
    %3 = vector.load %arg4[%c0_3, %c0_4] : memref<1x128xf32, #tpu.memory_space<vmem>>, vector<1x128xf32>
    %4 = vector.broadcast %3 : vector<1x128xf32> to vector<16x128xf32>
    %5 = arith.addf %2, %4 : vector<16x128xf32>
    %cst_5 = arith.constant 5.000000e-01 : f32
    %6 = vector.broadcast %cst_5 : f32 to vector<16x128xf32>
    %7 = arith.mulf %6, %5 : vector<16x128xf32>
    %cst_6 = arith.constant 0.707106769 : f32
    %8 = vector.broadcast %cst_6 : f32 to vector<16x128xf32>
    %9 = arith.mulf %5, %8 : vector<16x128xf32>
    %10 = math.erf %9 : vector<16x128xf32>
    %cst_7 = arith.constant 1.000000e+00 : f32
    %11 = vector.broadcast %cst_7 : f32 to vector<16x128xf32>
    %12 = arith.addf %11, %10 : vector<16x128xf32>
    %13 = arith.mulf %7, %12 : vector<16x128xf32>
    %c0_8 = arith.constant 0 : index
    %c0_9 = arith.constant 0 : index
    %14 = vector.load %arg5[%c0_8, %c0_9] : memref<16x128xf32, #tpu.memory_space<vmem>>, vector<16x128xf32>
    tpu.vector_store %arg5[%c0_8, %c0_9], %13 {strides = array<i32>} : memref<16x128xf32, #tpu.memory_space<vmem>>, vector<16x128xf32>,
    return
  }
  func.func @transform_0(%arg0: i32, %arg1: i32) -> (i32, i32) {
    %c0_i32 = arith.constant 0 : i32
    %c0_i32_0 = arith.constant 0 : i32
    return %arg0, %c0_i32 : i32, i32
  }
  func.func @transform_1(%arg0: i32, %arg1: i32) -> (i32, i32) {
    %c0_i32 = arith.constant 0 : i32
    %c0_i32_0 = arith.constant 0 : i32
    return %c0_i32, %arg1 : i32, i32
  }
  func.func @transform_2(%arg0: i32, %arg1: i32) -> (i32, i32) {
    %c0_i32 = arith.constant 0 : i32
    %c0_i32_0 = arith.constant 0 : i32
    return %c0_i32, %arg1 : i32, i32
  }
  func.func @transform_3(%arg0: i32, %arg1: i32) -> (i32, i32) {
    %c0_i32 = arith.constant 0 : i32
    return %arg0, %arg1 : i32, i32
  }
}

</mosaic_0001>

<bundles_post_ra>
// kernel: tpu_custom_call.1
= control target key start
LH: loop header
LB: loop body
LE: loop exit
PB: predicated region body
PF: predicated region fallthrough
CT: control target
= control target key end

     0   :  { %8 = vsyncpa [#allocation3], 0  ;;  %s350_s0 = inlined_call_operand.hbm [shape: f32[16,32], index: 0, kind: input, shape index: {}]   ;;  %s351_s1 = inlined_call_operand.hbm [shape: f32[32,128], index: 1, kind: input, shape index: {}]   ;;  %s352_s2 = inlined_call_operand.vmem [shape: f32[1,128], index: 2, kind: input, shape index: {}]   ;;  %s353_s3 = inlined_call_operand.hbm [shape: f32[16,128], index: 3, kind: output, shape index: {}]  }
   0x1   :  { %9 = vsyncpa [#allocation6], 0 }
   0x2   :  { %10 = vsyncpa [#allocation4], 0  ;;  %s277_s12 = smov [#allocation2]   ;;  %s205_s16 = scalar_lea.hbm %s350_s0, 256 }
   0x3   :  { %s16_s13 = sshll.u32 %s277_s12, 4  ;;  %p206_p0 = scmp.ne.s32.totalorder %s350_s0, %s205_s16  ;;  %s17_s13 = int_to_ptr.vmem [resolvable:$true] %s16_s13 }
   0x4   :  { %p209_p1 = scmp.lt.u32.totalorder %s205_s16, %s350_s0 }
   0x6   :  { %p211_p2 = pnand %p209_p1, %p206_p0 }
   0x8   :  { %214 = shalt.err (!%p211_p2)
}
   0x9   :  { %s215_s21 = scalar_lea.vmem %s17_s13, 256  ;;  %p220_p4 = scmp.lt.s32.totalorder %s17_s13, %s17_s13 }
   0xa   :  { %p216_p3 = scmp.ne.s32.totalorder %s17_s13, %s215_s21  ;;  %p221_p5 = scmp.lt.s32.totalorder %s215_s21, %s215_s21 }
   0xc   :  { %p222_p6 = por %p221_p5, %p220_p4 }
   0xe   :  { %p223_p7 = pnand %p222_p6, %p216_p3 }
  0x10   :  { %226 = shalt.err (!%p223_p7)
}
  0x11   :  { %s278_s22 = smov 128   ;;  %s279_s23 = smov 8  }
  0x12   :  { %22 = dma.hbm_to_vmem [thread:$0]  %s350_s0, 256, %s17_s13, [#allocation3], %s278_s22, %s278_s22, %s279_s23  }
  0x13   :  { %s280_s26 = smov [#allocation5]   ;;  %s227_s30 = scalar_lea.hbm %s351_s1, 512 }
  0x14   :  { %s28_s27 = sshll.u32 %s280_s26, 4  ;;  %p228_p8 = scmp.ne.s32.totalorder %s351_s1, %s227_s30  ;;  %s29_s27 = int_to_ptr.vmem [resolvable:$true] %s28_s27 }
  0x15   :  { %p231_p9 = scmp.lt.u32.totalorder %s227_s30, %s351_s1 }
  0x17   :  { %p233_p10 = pnand %p231_p9, %p228_p8 }
  0x19   :  { %236 = shalt.err (!%p233_p10)
}
  0x1a   :  { %s237_s8 = scalar_lea.vmem %s29_s27, 512  ;;  %p242_p12 = scmp.lt.s32.totalorder %s29_s27, %s29_s27 }
  0x1b   :  { %p238_p11 = scmp.ne.s32.totalorder %s29_s27, %s237_s8  ;;  %p243_p13 = scmp.lt.s32.totalorder %s237_s8, %s237_s8 }
  0x1d   :  { %p244_p0 = por %p243_p13, %p242_p12 }
  0x1f   :  { %p245_p1 = pnand %p244_p0, %p238_p11 }
  0x21   :  { %248 = shalt.err (!%p245_p1)
}
  0x22   :  { %34 = dma.hbm_to_vmem [thread:$0]  %s351_s1, 512, %s29_s27, [#allocation6], %s278_s22, %s278_s22, %s279_s23  }
  0x23   :  { %271 = dma.done.wait [#allocation3], 256  }
  0x24   :  { %272 = vsyncadd [#allocation3], 4294967040 }
  0x25   :  { %273 = dma.done.wait [#allocation6], 512  }
  0x26   :  { %274 = vsyncadd [#allocation6], 4294966784  ;;  %vm56_vm0 = vcmask 261120   ;;  %v45_v0 = vld [vmem:[#allocation5] sm:$0xff]  ;;  %v46_v1 = vld [vmem:[#allocation5 + $0x8] sm:$0xff]  ;;  %s281_s11 = smov [#allocation7]  }
  0x27   :  { %v47_v2 = vld [vmem:[#allocation5 + $0x10] sm:$0xff]  ;;  %v188_v3 = vpack.c.bf16 %v46_v1, %v45_v0  ;;  %v48_v4 = vld [vmem:[#allocation5 + $0x18] sm:$0xff]  ;;  %s155_s12 = sshll.u32 %s281_s11, 4  ;;  %s156_s12 = int_to_ptr.vmem [resolvable:$true] %s155_s12 }
  0x28   :  { %v43_v5 = vld [vmem:[#allocation2] sm:$0xff]  ;;  %v192_v6 = vpack.c.bf16 %v48_v4, %v47_v2  ;;  %v44_v7 = vld [vmem:[#allocation2 + $0x8] sm:$0xff]  ;;  %p254_p3 = scmp.lt.s32.totalorder %s156_s12, %s156_s12 }
  0x29   :  { %185 = vmatprep.mubr.msk.f32.mxu0 %vm56_vm0, %v43_v5  ;;  %189 = vmatprep.subr.bf16.mxu0 %v188_v3  ;;  %v168_v8 = vld [vmem:[%s352_s2] ss:$0 sm:$0xff]  ;;  %s249_s2 = scalar_lea.vmem %s156_s12, 256 }
  0x2a   :  { %191 = vmatpush3.bf16.msra.mxu0 %v188_v3  ;;  %p250_p2 = scmp.ne.s32.totalorder %s156_s12, %s249_s2  ;;  %p255_p4 = scmp.lt.s32.totalorder %s249_s2, %s249_s2 }
  0x2b   :  { %193 = vmatprep.subr.bf16.mxu0 %v192_v6 }
  0x2c   :  { %p256_p5 = por %p255_p4, %p254_p3 }
  0x2e   :  { %195 = vmatpush3.bf16.msra.mxu0 %v192_v6  ;;  %p257_p6 = pnand %p256_p5, %p250_p2 }
  0x31   :  { %186 = vmatmul.mubr.msk.f32.vlgmr.msra.gmra.mrb[0].mxu0 %vm56_vm0, %v44_v7 }
 0x104   :  { %v187_v9 = vpop.f32.mrb[0].mxu0 }
 0x105   :  { %v135_v10 = vadd.f32 %v187_v9, %v168_v8  ;;  %v129_v11 = vpop.f32.mrb[1].mxu0 }
 0x106   :  { %v130_v12 = vadd.f32 %v168_v8, %v129_v11 }
 0x107   :  { %v141_v13 = vmul.f32 0.70710677, %v135_v10  ;;  %v139_v17 = vmul.f32 0.5, %v135_v10 }
 0x108   :  { %v140_v14 = vmul.f32 0.70710677, %v130_v12  ;;  %v138_v19 = vmul.f32 0.5, %v130_v12 }
 0x109   :  { %201 = verf.f32 %v141_v13 }
 0x10a   :  { %203 = verf.f32 %v140_v14 }
 0x113   :  { %v202_v15 = vpop.eup %201 }
 0x114   :  { %v204_v16 = vpop.eup %203  ;;  %v145_v18 = vadd.f32 1.0, %v202_v15 }
 0x115   :  { %v144_v20 = vadd.f32 1.0, %v204_v16 }
 0x116   :  { %v147_v21 = vmul.f32 %v145_v18, %v139_v17 }
 0x117   :  { %v146_v22 = vmul.f32 %v144_v20, %v138_v19 }
 0x118   :  { %149 = vst [vmem:[#allocation7 + $0x8] sm:$0xff] %v147_v21 }
 0x119   :  { %148 = vst [vmem:[#allocation7] sm:$0xff] %v146_v22 }
 0x11a   :  { %260 = shalt.err (!%p257_p6)
}
 0x11b   :  { %s261_s15 = scalar_lea.hbm %s353_s3, 256 }
 0x11c   :  { %p262_p7 = scmp.ne.s32.totalorder %s353_s3, %s261_s15  ;;  %p265_p8 = scmp.lt.u32.totalorder %s261_s15, %s353_s3 }
 0x11e   :  { %p267_p9 = pnand %p265_p8, %p262_p7 }
 0x120   :  { %270 = shalt.err (!%p267_p9)
}
 0x121   :  { %161 = dma.vmem_to_hbm [thread:$0]  %s156_s12, 256, %s353_s3, [#allocation4], %s278_s22, %s278_s22, %s279_s23  }
 0x122   :  { %275 = dma.done.wait [#allocation4], 256  }
 0x123   :  { %276 = vsyncadd [#allocation4], 4294967040 }
 0x124   :  { %165 = vsyncpa [#allocation3], 1 }
 0x125   :  { %166 = vsyncpa [#allocation6], 1 }
 0x126   :  { %167 = vsyncpa [#allocation4], 1 }

</bundles_post_ra>
